<compile_context>
chip_gen: v7x
topology: tpu7x:2x2x1
jax: 0.10.0
libtpu: 0.0.40
codegen_flags: <defaults>
</compile_context>

<pallas_src>
import math

import jax
import jax.numpy as jnp
from jax.experimental import pallas as pl
from jax.experimental.pallas import tpu as pltpu

EPS = 1e-5
_LANE = 128
_MAX_TILE_ROWS = 2048                 # row-tile cap (w=128 -> 1 MiB per stream)
_MAX_FOLD_W = 512                     # cap on lcm(fc, 128) lane folding
_VMEM_TILE_BUDGET = 8 * 1024 * 1024   # bytes for the 4 double-buffered streams


def _complex_ln_folded_kernel(xr_ref, xi_ref, g_ref, b_ref, m_ref,
                              or_ref, oi_ref):
    """Lane-folded path: each W-wide row holds W // fc original rows.

    m_ref is a (W, W) block-diagonal averaging matrix (1/fc inside each
    fc-wide lane group), so x @ m is the per-group mean broadcast back to
    every lane of its group.  The MXU is otherwise idle in this memory-bound
    kernel, so the two small matmuls keep every load/store/VPU op 128-lane
    dense essentially for free.
    """
    rows, w = xr_ref.shape
    m = m_ref[...]
    # Hoist the (1, W) -> (rows, W) affine broadcasts: emitted once, shared by
    # the real and imag passes (JAX does not CSE broadcast_in_dim).
    g = jnp.broadcast_to(g_ref[...], (rows, w))
    b = jnp.broadcast_to(b_ref[...], (rows, w))

    def _ln(x):
        # precision=HIGHEST is required: DEFAULT (1-pass bf16) truncation of x
        # and (x-mean)^2 would blow past the 1e-5 tolerance.
        mean = jnp.dot(x, m, preferred_element_type=jnp.float32,
                       precision=jax.lax.Precision.HIGHEST)
        c = x - mean
        var = jnp.dot(c * c, m, preferred_element_type=jnp.float32,
                      precision=jax.lax.Precision.HIGHEST)
        return c * jax.lax.rsqrt(var + EPS) * g + b

    or_ref[...] = _ln(xr_ref[...])
    oi_ref[...] = _ln(xi_ref[...])


def _complex_ln_plain_kernel(xr_ref, xi_ref, g_ref, b_ref, or_ref, oi_ref):
    """General path: fc_dim sits on the lane axis, plain last-dim reductions."""
    rows, w = xr_ref.shape
    g = jnp.broadcast_to(g_ref[...], (rows, w))
    b = jnp.broadcast_to(b_ref[...], (rows, w))

    def _ln(x):
        mean = jnp.mean(x, axis=-1, keepdims=True)
        c = x - mean
        var = jnp.mean(c * c, axis=-1, keepdims=True)
        return c * jax.lax.rsqrt(var + EPS) * g + b

    or_ref[...] = _ln(xr_ref[...])
    oi_ref[...] = _ln(xi_ref[...])


def _pick_tile(r_rows, w):
    """Row-tile size + grid length for four f32 streams of shape (r_rows, w)."""
    bytes_per_row = 4 * w * 4                       # xr, xi, out_r, out_i
    rows_by_vmem = (_VMEM_TILE_BUDGET // (2 * bytes_per_row)) // 8 * 8
    cap = max(8, min(_MAX_TILE_ROWS, rows_by_vmem))
    if r_rows < 16:
        return r_rows, 1                            # single full-extent block
    # Keep >= 2 grid steps so the ("parallel",) axis shards rows across v7x's
    # two TensorCores (a single block would leave one TC idle).
    half = max(8, ((r_rows + 1) // 2) // 8 * 8)
    tile = min(cap, half)
    # Prefer a tile that divides r_rows exactly (no masked partial last
    # block), but never shrink the tile by more than 2x to get it.
    t = tile
    while t >= 8 and r_rows % t != 0:
        t -= 8
    if t >= 8 and 2 * t >= tile:
        tile = t
    return tile, pl.cdiv(r_rows, tile)


def complex_ln_split(x_real, x_imag, gamma, beta):
    """LayerNorm of x_real and x_imag over the last dim, shared (gamma, beta).

    Returns (ln_real, ln_imag) as two float32 arrays of x_real.shape — the
    zero-extra-HBM-traffic interface.  Use complex_ln() when the module's
    complex64 return type is required.
    """
    orig_shape = x_real.shape
    fc = orig_shape[-1]
    rows = int(math.prod(orig_shape[:-1]))

    xr2 = x_real.reshape(rows, fc).astype(jnp.float32)
    xi2 = x_imag.reshape(rows, fc).astype(jnp.float32)
    gamma = jnp.asarray(gamma, jnp.float32).reshape(fc)
    beta = jnp.asarray(beta, jnp.float32).reshape(fc)

    # Lane folding: fold g_fold rows into the lane axis so W = g_fold*fc is a
    # multiple of 128 (lane-dense, unmasked loads/stores).  Generalized to
    # W = lcm(fc, 128), e.g. fc=96 -> W=384 with 4 rows folded.
    g_fold = 1
    if fc % _LANE != 0:
        w_lcm = math.lcm(fc, _LANE)
        if w_lcm <= _MAX_FOLD_W and rows % (w_lcm // fc) == 0:
            g_fold = w_lcm // fc
    w = g_fold * fc
    r_rows = rows // g_fold

    xr_w = xr2.reshape(r_rows, w)
    xi_w = xi2.reshape(r_rows, w)
    g_w = jnp.tile(gamma, g_fold).reshape(1, w)
    b_w = jnp.tile(beta, g_fold).reshape(1, w)

    tile_r, grid_r = _pick_tile(r_rows, w)

    row_spec = pl.BlockSpec((tile_r, w), lambda i: (i, 0))
    vec_spec = pl.BlockSpec((1, w), lambda i: (0, 0))       # resident

    compiler_params = pltpu.CompilerParams(
        dimension_semantics=("parallel",),       # row axis shards over 2 TCs
        vmem_limit_bytes=32 * 1024 * 1024,
    )
    out_shapes = (jax.ShapeDtypeStruct((r_rows, w), jnp.float32),
                  jax.ShapeDtypeStruct((r_rows, w), jnp.float32))

    if g_fold > 1:
        # Block-diagonal averaging matrix: 1/fc inside each fc-wide lane group.
        # Built once in the wrapper and kept resident via a constant index_map;
        # building it in-kernel would need vector integer division (risky to
        # lower) for a <1% gain.
        lane = jnp.arange(w, dtype=jnp.int32)
        same_group = (lane[:, None] // fc) == (lane[None, :] // fc)
        avg_mat = same_group.astype(jnp.float32) * jnp.float32(1.0 / fc)
        mat_spec = pl.BlockSpec((w, w), lambda i: (0, 0))    # resident
        out_r, out_i = pl.pallas_call(
            _complex_ln_folded_kernel,
            out_shape=out_shapes,
            grid=(grid_r,),
            in_specs=[row_spec, row_spec, vec_spec, vec_spec, mat_spec],
            out_specs=(row_spec, row_spec),
            compiler_params=compiler_params,
        )(xr_w, xi_w, g_w, b_w, avg_mat)
    else:
        out_r, out_i = pl.pallas_call(
            _complex_ln_plain_kernel,
            out_shape=out_shapes,
            grid=(grid_r,),
            in_specs=[row_spec, row_spec, vec_spec, vec_spec],
            out_specs=(row_spec, row_spec),
            compiler_params=compiler_params,
        )(xr_w, xi_w, g_w, b_w)

    return out_r.reshape(orig_shape), out_i.reshape(orig_shape)


def complex_ln(x_real, x_imag, gamma, beta):
    """Module-faithful interface: complex64 = complex(LN(real), LN(imag))."""
    out_r, out_i = complex_ln_split(x_real, x_imag, gamma, beta)
    # TODO(synk): JAX/XLA cannot bitcast f32 <-> complex64, so packing into the
    # module's complex return type costs one extra HBM read+write of both
    # halves; callers that can consume split parts should use complex_ln_split.
    return jax.lax.complex(out_r, out_i)


def _ref_complex_ln(x_real, x_imag, gamma, beta):
    def ln(x):
        mean = jnp.mean(x, axis=-1, keepdims=True)
        var = jnp.mean((x - mean) ** 2, axis=-1, keepdims=True)
        return (x - mean) * jax.lax.rsqrt(var + EPS) * gamma + beta
    return jax.lax.complex(ln(x_real), ln(x_imag))


if __name__ == "__main__":
    key = jax.random.PRNGKey(0)

    def check(B, S, FC, key):
        k_r, k_i, k_g, k_b = jax.random.split(key, 4)
        x_real = jax.random.normal(k_r, (B, S, FC), dtype=jnp.float32)
        x_imag = jax.random.normal(k_i, (B, S, FC), dtype=jnp.float32)
        gamma = 1.0 + 0.1 * jax.random.normal(k_g, (FC,), dtype=jnp.float32)
        beta = 0.1 * jax.random.normal(k_b, (FC,), dtype=jnp.float32)

        out = jax.block_until_ready(complex_ln(x_real, x_imag, gamma, beta))
        ref = _ref_complex_ln(x_real, x_imag, gamma, beta)

        assert out.dtype == jnp.complex64
        assert out.shape == (B, S, FC)
        assert jnp.allclose(out.real, ref.real, atol=1e-5, rtol=1e-5)
        assert jnp.allclose(out.imag, ref.imag, atol=1e-5, rtol=1e-5)

    keys = jax.random.split(key, 4)
    # Folded lane-dense path (W=128), single full-extent block.
    check(B=2, S=8, FC=32, key=keys[0])
    # lcm folding: fc=96 -> W=384, single block.
    check(B=2, S=8, FC=96, key=keys[1])
    # Folded path, multi-block grid with a masked partial last block.
    check(B=2, S=1100, FC=32, key=keys[2])
    # Plain (unfolded) path, grid_r = 2 so both v7x TCs get work.
    check(B=2, S=8, FC=100, key=keys[3])

    print("KERNEL_OK")
</pallas_src>

<mosaic_0001>
module attributes {stable_mosaic.version = 11 : i64} {
  func.func @_complex_ln_folded_kernel(%arg0: i32, %arg1: memref<4x128xf32, #tpu.memory_space<vmem>>, %arg2: memref<4x128xf32, #tpu.memory_space<vmem>>, %arg3: memref<1x128xf32, #tpu.memory_space<vmem>>, %arg4: memref<1x128xf32, #tpu.memory_space<vmem>>, %arg5: memref<128x128xf32, #tpu.memory_space<vmem>>, %arg6: memref<4x128xf32, #tpu.memory_space<vmem>>, %arg7: memref<4x128xf32, #tpu.memory_space<vmem>>) attributes {dimension_semantics = [#tpu.dimension_semantics<parallel>], iteration_bounds = array<i64: 1>, scalar_prefetch = 0 : i64, scratch_operands = 0 : i64, tpu.core_type = #tpu.core_type<tc>, window_params = [{transform_indices = @transform_0, window_bounds = array<i64: 4, 128>}, {transform_indices = @transform_1, window_bounds = array<i64: 4, 128>}, {pipeline_mode = #tpu.pipeline_mode<synchronous>, transform_indices = @transform_2, window_bounds = array<i64: 1, 128>}, {pipeline_mode = #tpu.pipeline_mode<synchronous>, transform_indices = @transform_3, window_bounds = array<i64: 1, 128>}, {pipeline_mode = #tpu.pipeline_mode<synchronous>, transform_indices = @transform_4, window_bounds = array<i64: 128, 128>}, {transform_indices = @transform_5, window_bounds = array<i64: 4, 128>}, {transform_indices = @transform_6, window_bounds = array<i64: 4, 128>}]} {
    %c0 = arith.constant 0 : index
    %c0_0 = arith.constant 0 : index
    %0 = vector.load %arg5[%c0, %c0_0] : memref<128x128xf32, #tpu.memory_space<vmem>>, vector<128x128xf32>
    %c0_1 = arith.constant 0 : index
    %c0_2 = arith.constant 0 : index
    %1 = vector.load %arg3[%c0_1, %c0_2] : memref<1x128xf32, #tpu.memory_space<vmem>>, vector<1x128xf32>
    %2 = vector.shape_cast %1 : vector<1x128xf32> to vector<1x128xf32>
    %3 = vector.broadcast %2 : vector<1x128xf32> to vector<4x128xf32>
    %c0_3 = arith.constant 0 : index
    %c0_4 = arith.constant 0 : index
    %4 = vector.load %arg4[%c0_3, %c0_4] : memref<1x128xf32, #tpu.memory_space<vmem>>, vector<1x128xf32>
    %5 = vector.shape_cast %4 : vector<1x128xf32> to vector<1x128xf32>
    %6 = vector.broadcast %5 : vector<1x128xf32> to vector<4x128xf32>
    %c0_5 = arith.constant 0 : index
    %c0_6 = arith.constant 0 : index
    %7 = vector.load %arg1[%c0_5, %c0_6] : memref<4x128xf32, #tpu.memory_space<vmem>>, vector<4x128xf32>
    %cst = arith.constant dense<0.000000e+00> : vector<4x128xf32>
    %8 = tpu.matmul %7, %0, %cst {dimension_numbers = #tpu.dot_dimension_numbers<[1], [0], [0], [1], [0, 0, 1, 1], [], []>, precision = #tpu.contract_precision<fp32>} : vector<4x128xf32>, vector<128x128xf32>, vector<4x128xf32> -> vector<4x128xf32>
    %9 = arith.subf %7, %8 : vector<4x128xf32>
    %10 = arith.mulf %9, %9 : vector<4x128xf32>
    %cst_7 = arith.constant dense<0.000000e+00> : vector<4x128xf32>
    %11 = tpu.matmul %10, %0, %cst_7 {dimension_numbers = #tpu.dot_dimension_numbers<[1], [0], [0], [1], [0, 0, 1, 1], [], []>, precision = #tpu.contract_precision<fp32>} : vector<4x128xf32>, vector<128x128xf32>, vector<4x128xf32> -> vector<4x128xf32>
    %cst_8 = arith.constant 9.99999974E-6 : f32
    %12 = vector.broadcast %cst_8 : f32 to vector<4x128xf32>
    %13 = arith.addf %11, %12 : vector<4x128xf32>
    %14 = math.rsqrt %13 : vector<4x128xf32>
    %15 = arith.mulf %9, %14 : vector<4x128xf32>
    %16 = arith.mulf %15, %3 : vector<4x128xf32>
    %17 = arith.addf %16, %6 : vector<4x128xf32>
    %c0_9 = arith.constant 0 : index
    %c0_10 = arith.constant 0 : index
    %18 = vector.load %arg6[%c0_9, %c0_10] : memref<4x128xf32, #tpu.memory_space<vmem>>, vector<4x128xf32>
    tpu.vector_store %arg6[%c0_9, %c0_10], %17 {strides = array<i32>} : memref<4x128xf32, #tpu.memory_space<vmem>>, vector<4x128xf32>,
    %c0_11 = arith.constant 0 : index
    %c0_12 = arith.constant 0 : index
    %19 = vector.load %arg2[%c0_11, %c0_12] : memref<4x128xf32, #tpu.memory_space<vmem>>, vector<4x128xf32>
    %cst_13 = arith.constant dense<0.000000e+00> : vector<4x128xf32>
    %20 = tpu.matmul %19, %0, %cst_13 {dimension_numbers = #tpu.dot_dimension_numbers<[1], [0], [0], [1], [0, 0, 1, 1], [], []>, precision = #tpu.contract_precision<fp32>} : vector<4x128xf32>, vector<128x128xf32>, vector<4x128xf32> -> vector<4x128xf32>
    %21 = arith.subf %19, %20 : vector<4x128xf32>
    %22 = arith.mulf %21, %21 : vector<4x128xf32>
    %cst_14 = arith.constant dense<0.000000e+00> : vector<4x128xf32>
    %23 = tpu.matmul %22, %0, %cst_14 {dimension_numbers = #tpu.dot_dimension_numbers<[1], [0], [0], [1], [0, 0, 1, 1], [], []>, precision = #tpu.contract_precision<fp32>} : vector<4x128xf32>, vector<128x128xf32>, vector<4x128xf32> -> vector<4x128xf32>
    %cst_15 = arith.constant 9.99999974E-6 : f32
    %24 = vector.broadcast %cst_15 : f32 to vector<4x128xf32>
    %25 = arith.addf %23, %24 : vector<4x128xf32>
    %26 = math.rsqrt %25 : vector<4x128xf32>
    %27 = arith.mulf %21, %26 : vector<4x128xf32>
    %28 = arith.mulf %27, %3 : vector<4x128xf32>
    %29 = arith.addf %28, %6 : vector<4x128xf32>
    %c0_16 = arith.constant 0 : index
    %c0_17 = arith.constant 0 : index
    %30 = vector.load %arg7[%c0_16, %c0_17] : memref<4x128xf32, #tpu.memory_space<vmem>>, vector<4x128xf32>
    tpu.vector_store %arg7[%c0_16, %c0_17], %29 {strides = array<i32>} : memref<4x128xf32, #tpu.memory_space<vmem>>, vector<4x128xf32>,
    return
  }
  func.func @transform_0(%arg0: i32) -> (i32, i32) {
    %c0_i32 = arith.constant 0 : i32
    %c0_i32_0 = arith.constant 0 : i32
    return %arg0, %c0_i32 : i32, i32
  }
  func.func @transform_1(%arg0: i32) -> (i32, i32) {
    %c0_i32 = arith.constant 0 : i32
    %c0_i32_0 = arith.constant 0 : i32
    return %arg0, %c0_i32 : i32, i32
  }
  func.func @transform_2(%arg0: i32) -> (i32, i32) {
    %c0_i32 = arith.constant 0 : i32
    %c0_i32_0 = arith.constant 0 : i32
    %c0_i32_1 = arith.constant 0 : i32
    return %c0_i32, %c0_i32_0 : i32, i32
  }
  func.func @transform_3(%arg0: i32) -> (i32, i32) {
    %c0_i32 = arith.constant 0 : i32
    %c0_i32_0 = arith.constant 0 : i32
    %c0_i32_1 = arith.constant 0 : i32
    return %c0_i32, %c0_i32_0 : i32, i32
  }
  func.func @transform_4(%arg0: i32) -> (i32, i32) {
    %c0_i32 = arith.constant 0 : i32
    %c0_i32_0 = arith.constant 0 : i32
    %c0_i32_1 = arith.constant 0 : i32
    return %c0_i32, %c0_i32_0 : i32, i32
  }
  func.func @transform_5(%arg0: i32) -> (i32, i32) {
    %c0_i32 = arith.constant 0 : i32
    %c0_i32_0 = arith.constant 0 : i32
    return %arg0, %c0_i32 : i32, i32
  }
  func.func @transform_6(%arg0: i32) -> (i32, i32) {
    %c0_i32 = arith.constant 0 : i32
    %c0_i32_0 = arith.constant 0 : i32
    return %arg0, %c0_i32 : i32, i32
  }
}

</mosaic_0001>

<bundles_post_ra>
// kernel: tpu_custom_call.1
= control target key start
LH: loop header
LB: loop body
LE: loop exit
PB: predicated region body
PF: predicated region fallthrough
CT: control target
= control target key end

     0   :  { %12 = vsyncpa [#allocation3], 0  ;;  %s5446_s0 = inlined_call_operand.hbm [shape: f32[4,128], index: 0, kind: input, shape index: {}]   ;;  %s5447_s1 = inlined_call_operand.hbm [shape: f32[4,128], index: 1, kind: input, shape index: {}]   ;;  %s5448_s2 = inlined_call_operand.vmem [shape: f32[1,128], index: 2, kind: input, shape index: {}]   ;;  %s5449_s3 = inlined_call_operand.vmem [shape: f32[1,128], index: 3, kind: input, shape index: {}]   ;;  %s5450_s4 = inlined_call_operand.hbm [shape: f32[128,128], index: 4, kind: input, shape index: {}]   ;;  %s5451_s5 = inlined_call_operand.hbm [shape: f32[4,128], index: 5, kind: output, shape index: {0}]   ;;  %s5452_s6 = inlined_call_operand.hbm [shape: f32[4,128], index: 6, kind: output, shape index: {1}]  }
   0x1   :  { %13 = vsyncpa [#allocation6], 0 }
   0x2   :  { %14 = vsyncpa [#allocation4], 0 }
   0x3   :  { %15 = vsyncpa [#allocation10], 0  ;;  %s4701_s21 = smov [#allocation5]   ;;  %s4702_s23 = smov [#allocation2]  }
   0x4   :  { %s32_s22 = sshll.u32 %s4701_s21, 4  ;;  %s22_s24 = sshll.u32 %s4702_s23, 4  ;;  %s33_s22 = int_to_ptr.vmem [resolvable:$true] %s32_s22  ;;  %s23_s24 = int_to_ptr.vmem [resolvable:$true] %s22_s24 }
   0x5   :  { %s4583_s27 = scalar_lea.hbm %s5447_s1, 64 }
   0x6   :  { %p4584_p0 = scmp.ne.s32.totalorder %s5447_s1, %s4583_s27  ;;  %p4587_p1 = scmp.lt.u32.totalorder %s4583_s27, %s5447_s1 }
   0x8   :  { %p4589_p2 = pnand %p4587_p1, %p4584_p0 }
   0xa   :  { %4592 = shalt.err (!%p4589_p2)
}
   0xb   :  { %s4593_s8 = scalar_lea.vmem %s33_s22, 64  ;;  %p4598_p4 = scmp.lt.s32.totalorder %s33_s22, %s33_s22 }
   0xc   :  { %p4594_p3 = scmp.ne.s32.totalorder %s33_s22, %s4593_s8  ;;  %p4599_p5 = scmp.lt.s32.totalorder %s4593_s8, %s4593_s8 }
   0xe   :  { %p4600_p6 = por %p4599_p5, %p4598_p4 }
  0x10   :  { %p4601_p7 = pnand %p4600_p6, %p4594_p3 }
  0x12   :  { %4604 = shalt.err (!%p4601_p7)
}
  0x13   :  { %35 = dma.hbm_to_vmem [thread:$0]  %s5447_s1, 64, %s33_s22, [#allocation6]  }
  0x14   :  { %s4605_s13 = scalar_lea.hbm %s5446_s0, 64 }
  0x15   :  { %p4606_p8 = scmp.ne.s32.totalorder %s5446_s0, %s4605_s13  ;;  %p4609_p9 = scmp.lt.u32.totalorder %s4605_s13, %s5446_s0 }
  0x17   :  { %p4611_p10 = pnand %p4609_p9, %p4606_p8 }
  0x19   :  { %4614 = shalt.err (!%p4611_p10)
}
  0x1a   :  { %s4615_s18 = scalar_lea.vmem %s23_s24, 64  ;;  %p4620_p12 = scmp.lt.s32.totalorder %s23_s24, %s23_s24 }
  0x1b   :  { %p4616_p11 = scmp.ne.s32.totalorder %s23_s24, %s4615_s18  ;;  %p4621_p13 = scmp.lt.s32.totalorder %s4615_s18, %s4615_s18 }
  0x1d   :  { %p4622_p0 = por %p4621_p13, %p4620_p12 }
  0x1f   :  { %p4623_p1 = pnand %p4622_p0, %p4616_p11 }
  0x21   :  { %4626 = shalt.err (!%p4623_p1)
}
  0x22   :  { %25 = dma.hbm_to_vmem [thread:$0]  %s5446_s0, 64, %s23_s24, [#allocation3]  }
  0x23   :  { %s4703_s20 = smov [#allocation7]   ;;  %s4627_s25 = scalar_lea.hbm %s5450_s4, 2048 }
  0x24   :  { %s45_s21 = sshll.u32 %s4703_s20, 4  ;;  %p4628_p2 = scmp.ne.s32.totalorder %s5450_s4, %s4627_s25  ;;  %s46_s21 = int_to_ptr.vmem [resolvable:$true] %s45_s21 }
  0x25   :  { %p4631_p3 = scmp.lt.u32.totalorder %s4627_s25, %s5450_s4 }
  0x27   :  { %p4633_p4 = pnand %p4631_p3, %p4628_p2 }
  0x29   :  { %4636 = shalt.err (!%p4633_p4)
}
  0x2a   :  { %s4637_s30 = scalar_lea.vmem %s46_s21, 2048  ;;  %p4642_p6 = scmp.lt.s32.totalorder %s46_s21, %s46_s21 }
  0x2b   :  { %p4638_p5 = scmp.ne.s32.totalorder %s46_s21, %s4637_s30  ;;  %p4643_p7 = scmp.lt.s32.totalorder %s4637_s30, %s4637_s30 }
  0x2d   :  { %p4644_p8 = por %p4643_p7, %p4642_p6 }
  0x2f   :  { %p4645_p9 = pnand %p4644_p8, %p4638_p5 }
  0x31   :  { %4648 = shalt.err (!%p4645_p9)
}
  0x32   :  { %s4704_s0 = smov 128   ;;  %s4705_s24 = smov 8  }
  0x33   :  { %51 = dma.hbm_to_vmem [thread:$0]  %s5450_s4, 2048, %s46_s21, [#allocation6], %s4704_s0, %s4704_s0, %s4705_s24  }
  0x34   :  { %4693 = dma.done.wait [#allocation3], 64  }
  0x35   :  { %4694 = vsyncadd [#allocation3], 4294967232 }
  0x36   :  { %4695 = dma.done.wait [#allocation6], 2112  }
  0x37   :  { %4696 = vsyncadd [#allocation6], 4294965184  ;;  %v4706_v0 = vmov 0.0|0.0   ;;  %vm4707_vm0 = vmmov 0   ;;  %v4708_v1 = vmov 0.0   ;;  %v61_v2 = vld [vmem:[#allocation7] sm:$0xff] }
  0x38   :  { %3951 = vmatprep.subr.bf16.mxu0 %v4706_v0  ;;  %3143 = vmatprep.mubr.msk.f32.mxu0 %vm4707_vm0, %v4708_v1  ;;  %v62_v3 = vld [vmem:[#allocation7 + $0x8] sm:$0xff]  ;;  %v63_v4 = vld [vmem:[#allocation7 + $0x10] sm:$0xff]  ;;  %v93_v5 = vand.u32 4294901760, %v61_v2  ;;  %v64_v7 = vld [vmem:[#allocation7 + $0x18] sm:$0xff]  ;;  %s4709_s12 = smov [#allocation8]  }
  0x39   :  { %4095 = vmatprep.subr.bf16.mxu1 %v4706_v0  ;;  %3353 = vmatprep.mubr.msk.f32.mxu1 %vm4707_vm0, %v4708_v1  ;;  %v96_v6 = vand.u32 4294901760, %v62_v3  ;;  %v99_v8 = vand.u32 4294901760, %v63_v4  ;;  %v102_v9 = vand.u32 4294901760, %v64_v7  ;;  %v65_v10 = vld [vmem:[#allocation7 + $0x20] sm:$0xff]  ;;  %v66_v11 = vld [vmem:[#allocation7 + $0x28] sm:$0xff]  ;;  %v67_v16 = vld [vmem:[#allocation7 + $0x30] sm:$0xff] }
  0x3a   :  { %v105_v14 = vand.u32 4294901760, %v65_v10  ;;  %v108_v15 = vand.u32 4294901760, %v66_v11  ;;  %v68_v17 = vld [vmem:[#allocation7 + $0x38] sm:$0xff]  ;;  %v111_v19 = vand.u32 4294901760, %v67_v16  ;;  %v69_v21 = vld [vmem:[#allocation7 + $0x40] sm:$0xff]  ;;  %v70_v23 = vld [vmem:[#allocation7 + $0x48] sm:$0xff]  ;;  %v4810_v34 = vsub.f32 %v61_v2, %v93_v5 }
  0x3b   :  { %v4788_v12 = vpack.c.bf16 %v96_v6, %v93_v5  ;;  %v4791_v13 = vpack.c.bf16 %v102_v9, %v99_v8  ;;  %v114_v20 = vand.u32 4294901760, %v68_v17  ;;  %v4799_v22 = vld [vmem:[#allocation2] sm:$0xf]  ;;  %v71_v24 = vld [vmem:[#allocation7 + $0x50] sm:$0xff]  ;;  %v73_v26 = vld [vmem:[#allocation7 + $0x60] sm:$0xff]  ;;  %v117_v27 = vand.u32 4294901760, %v69_v21 }
  0x3c   :  { %v4797_v18 = vpack.c.bf16 %v108_v15, %v105_v14  ;;  %v72_v25 = vld [vmem:[#allocation7 + $0x58] sm:$0xff]  ;;  %v74_v28 = vld [vmem:[#allocation7 + $0x68] sm:$0xff]  ;;  %v75_v29 = vld [vmem:[#allocation7 + $0x70] sm:$0xff]  ;;  %v4805_v31 = vand.u32 4294901760, %v4799_v22  ;;  %v120_v33 = vand.u32 4294901760, %v70_v23  ;;  %v4812_v35 = vsub.f32 %v62_v3, %v96_v6  ;;  %s2677_s13 = sshll.u32 %s4709_s12, 4  ;;  %s2678_s13 = int_to_ptr.vmem [resolvable:$true] %s2677_s13 }
  0x3d   :  { %3953 = vmatpush3.bf16.msra.mxu0 %v4788_v12  ;;  %4097 = vmatpush3.bf16.msra.mxu1 %v4788_v12  ;;  %v76_v30 = vld [vmem:[#allocation7 + $0x78] sm:$0xff]  ;;  %v4808_v32 = vpack.c.bf16 %v114_v20, %v111_v19  ;;  %v123_v36 = vand.u32 4294901760, %v71_v24  ;;  %v126_v37 = vand.u32 4294901760, %v72_v25  ;;  %v129_v38 = vand.u32 4294901760, %v73_v26  ;;  %s4649_s14 = scalar_lea.vmem %s2678_s13, 64  ;;  %p4654_p11 = scmp.lt.s32.totalorder %s2678_s13, %s2678_s13 }
  0x3e   :  { %3954 = vmatprep.subr.bf16.mxu0 %v4706_v0  ;;  %4098 = vmatprep.subr.bf16.mxu1 %v4706_v0  ;;  %v132_v39 = vand.u32 4294901760, %v74_v28  ;;  %v135_v40 = vand.u32 4294901760, %v75_v29  ;;  %v138_v41 = vand.u32 4294901760, %v76_v30  ;;  %v4819_v42 = vsub.f32 %v4799_v22, %v4805_v31  ;;  %p4650_p10 = scmp.ne.s32.totalorder %s2678_s13, %s4649_s14  ;;  %p4655_p12 = scmp.lt.s32.totalorder %s4649_s14, %s4649_s14 }
  0x3f   :  { %v4821_v43 = vsub.f32 %v63_v4, %v99_v8  ;;  %v4824_v44 = vpack.c.bf16 %v120_v33, %v117_v27  ;;  %v186_v45 = vand.u32 4294901760, %v4810_v34  ;;  %v193_v46 = vand.u32 4294901760, %v4812_v35 }
  0x40   :  { %v4828_v47 = vsub.f32 %v64_v7, %v102_v9  ;;  %v4832_v48 = vsub.f32 %v65_v10, %v105_v14  ;;  %v4835_v49 = vpack.c.bf16 %v126_v37, %v123_v36  ;;  %v4837_v50 = vpack.c.bf16 %v132_v39, %v129_v38  ;;  %p4656_p13 = por %p4655_p12, %p4654_p11 }
  0x41   :  { %3956 = vmatpush3.bf16.msra.mxu0 %v4791_v13  ;;  %4100 = vmatpush3.bf16.msra.mxu1 %v4791_v13  ;;  %v4839_v51 = vpack.c.bf16 %v138_v41, %v135_v40  ;;  %v175_v52 = vand.u32 4294901760, %v4819_v42  ;;  %v200_v53 = vand.u32 4294901760, %v4821_v43  ;;  %v4843_v54 = vsub.f32 %v66_v11, %v108_v15 }
  0x42   :  { %3957 = vmatprep.subr.bf16.mxu0 %v4706_v0  ;;  %4101 = vmatprep.subr.bf16.mxu1 %v4706_v0  ;;  %v4845_v55 = vsub.f32 %v67_v16, %v111_v19  ;;  %v187_v56 = vsub.f32 %v4810_v34, %v186_v45  ;;  %v194_v57 = vsub.f32 %v4812_v35, %v193_v46  ;;  %v207_v58 = vand.u32 4294901760, %v4828_v47  ;;  %p4657_p0 = pnand %p4656_p13, %p4650_p10 }
  0x43   :  { %v4851_v59 = vsub.f32 %v68_v17, %v114_v20  ;;  %v214_v60 = vand.u32 4294901760, %v4832_v48  ;;  %v4856_v61 = vsub.f32 %v69_v21, %v117_v27  ;;  %v4858_v62 = vsub.f32 %v70_v23, %v120_v33 }
  0x44   :  { %v4860_v63 = vsub.f32 %v71_v24, %v123_v36  ;;  %v4863_v2 = vsub.f32 %v72_v25, %v126_v37  ;;  %v4865_v3 = vsub.f32 %v73_v26, %v129_v38  ;;  %v4867_v4 = vsub.f32 %v74_v28, %v132_v39 }
  0x45   :  { %3959 = vmatpush3.bf16.msra.mxu0 %v4797_v18  ;;  %4103 = vmatpush3.bf16.msra.mxu1 %v4797_v18  ;;  %v4869_v5 = vsub.f32 %v75_v29, %v135_v40  ;;  %v176_v6 = vsub.f32 %v4819_v42, %v175_v52  ;;  %v201_v7 = vsub.f32 %v4821_v43, %v200_v53  ;;  %v221_v8 = vand.u32 4294901760, %v4843_v54 }
  0x46   :  { %3960 = vmatprep.subr.bf16.mxu0 %v4706_v0  ;;  %4104 = vmatprep.subr.bf16.mxu1 %v4706_v0  ;;  %v4876_v9 = vsub.f32 %v76_v30, %v138_v41  ;;  %v188_v10 = vand.u32 4294901760, %v187_v56  ;;  %v195_v11 = vand.u32 4294901760, %v194_v57  ;;  %v208_v14 = vsub.f32 %v4828_v47, %v207_v58 }
  0x47   :  { %v228_v15 = vand.u32 4294901760, %v4845_v55  ;;  %v235_v16 = vand.u32 4294901760, %v4851_v59  ;;  %v242_v17 = vand.u32 4294901760, %v4856_v61  ;;  %v249_v19 = vand.u32 4294901760, %v4858_v62 }
  0x48   :  { %v256_v20 = vand.u32 4294901760, %v4860_v63  ;;  %v263_v21 = vand.u32 4294901760, %v4863_v2  ;;  %v270_v23 = vand.u32 4294901760, %v4865_v3  ;;  %v277_v24 = vand.u32 4294901760, %v4867_v4 }
  0x49   :  { %3962 = vmatpush3.bf16.msra.mxu0 %v4808_v32  ;;  %4106 = vmatpush3.bf16.msra.mxu1 %v4808_v32  ;;  %v284_v25 = vand.u32 4294901760, %v4869_v5  ;;  %v291_v26 = vand.u32 4294901760, %v4876_v9  ;;  %v4893_v27 = vpack.c.bf16 %v193_v46, %v186_v45  ;;  %v4895_v28 = vpack.c.bf16 %v207_v58, %v200_v53 }
  0x4a   :  { %3963 = vmatprep.subr.bf16.mxu0 %v4706_v0  ;;  %4107 = vmatprep.subr.bf16.mxu1 %v4706_v0  ;;  %v4897_v29 = vpack.c.bf16 %v221_v8, %v214_v60  ;;  %v4900_v30 = vpack.c.bf16 %v235_v16, %v228_v15  ;;  %v4902_v33 = vpack.c.bf16 %v249_v19, %v242_v17  ;;  %v177_v39 = vand.u32 4294901760, %v176_v6 }
  0x4b   :  { %v4904_v36 = vpack.c.bf16 %v263_v21, %v256_v20  ;;  %v4906_v37 = vpack.c.bf16 %v277_v24, %v270_v23  ;;  %v4909_v38 = vpack.c.bf16 %v291_v26, %v284_v25  ;;  %v215_v40 = vsub.f32 %v4832_v48, %v214_v60 }
  0x4c   :  { %v4915_v41 = vpack.c.bf16 %v195_v11, %v188_v10  ;;  %v202_v45 = vand.u32 4294901760, %v201_v7  ;;  %v209_v46 = vand.u32 4294901760, %v208_v14  ;;  %v222_v53 = vsub.f32 %v4843_v54, %v221_v8 }
  0x4d   :  { %3965 = vmatpush3.bf16.msra.mxu0 %v4824_v44  ;;  %4109 = vmatpush3.bf16.msra.mxu1 %v4824_v44  ;;  %v229_v56 = vsub.f32 %v4845_v55, %v228_v15  ;;  %v216_v58 = vand.u32 4294901760, %v215_v40  ;;  %v236_v6 = vsub.f32 %v4851_v59, %v235_v16  ;;  %v243_v11 = vsub.f32 %v4856_v61, %v242_v17 }
  0x4e   :  { %3966 = vmatprep.subr.bf16.mxu0 %v4706_v0  ;;  %4110 = vmatprep.subr.bf16.mxu1 %v4706_v0  ;;  %v4923_v57 = vpack.c.bf16 %v209_v46, %v202_v45  ;;  %v223_v60 = vand.u32 4294901760, %v222_v53  ;;  %v250_v14 = vsub.f32 %v4858_v62, %v249_v19  ;;  %v257_v15 = vsub.f32 %v4860_v63, %v256_v20 }
  0x4f   :  { %v230_v7 = vand.u32 4294901760, %v229_v56  ;;  %v237_v10 = vand.u32 4294901760, %v236_v6  ;;  %v264_v45 = vsub.f32 %v4863_v2, %v263_v21  ;;  %v271_v46 = vsub.f32 %v4865_v3, %v270_v23 }
  0x50   :  { %v4930_v8 = vpack.c.bf16 %v223_v60, %v216_v58  ;;  %v251_v40 = vand.u32 4294901760, %v250_v14  ;;  %v258_v19 = vand.u32 4294901760, %v257_v15  ;;  %v278_v20 = vsub.f32 %v4867_v4, %v277_v24 }
  0x51   :  { %3968 = vmatpush3.bf16.msra.mxu0 %v4835_v49  ;;  %4112 = vmatpush3.bf16.msra.mxu1 %v4835_v49  ;;  %v4937_v16 = vpack.c.bf16 %v237_v10, %v230_v7  ;;  %v265_v53 = vand.u32 4294901760, %v264_v45  ;;  %v285_v56 = vsub.f32 %v4869_v5, %v284_v25  ;;  %v272_v21 = vand.u32 4294901760, %v271_v46 }
  0x52   :  { %3969 = vmatprep.subr.bf16.mxu0 %v4706_v0  ;;  %4113 = vmatprep.subr.bf16.mxu1 %v4706_v0  ;;  %v279_v60 = vand.u32 4294901760, %v278_v20  ;;  %v292_v23 = vsub.f32 %v4876_v9, %v291_v26  ;;  %v4964_v26 = vpack.c.bf16 %v4812_v35, %v4810_v34  ;;  %v4971_v10 = vpack.c.bf16 %v4828_v47, %v4821_v43 }
  0x53   :  { %v4949_v58 = vpack.c.bf16 %v265_v53, %v258_v19  ;;  %v286_v7 = vand.u32 4294901760, %v285_v56  ;;  %v4979_v34 = vpack.c.bf16 %v4843_v54, %v4832_v48  ;;  %v4985_v35 = vpack.c.bf16 %v4851_v59, %v4845_v55 }
  0x54   :  { %v4954_v6 = vpack.c.bf16 %v279_v60, %v272_v21  ;;  %v293_v24 = vand.u32 4294901760, %v292_v23  ;;  %v4991_v43 = vpack.c.bf16 %v4858_v62, %v4856_v61  ;;  %v4997_v47 = vpack.c.bf16 %v4863_v2, %v4860_v63 }
  0x55   :  { %3971 = vmatpush3.bf16.msra.mxu0 %v4837_v50  ;;  %4115 = vmatpush3.bf16.msra.mxu1 %v4837_v50  ;;  %v5003_v48 = vpack.c.bf16 %v4867_v4, %v4865_v3  ;;  %v5009_v54 = vpack.c.bf16 %v4876_v9, %v4869_v5 }
  0x56   :  { %3972 = vmatprep.subr.bf16.mxu0 %v4706_v0  ;;  %4116 = vmatprep.subr.bf16.mxu1 %v4706_v0  ;;  %v4958_v25 = vpack.c.bf16 %v293_v24, %v286_v7 }
  0x59   :  { %3974 = vmatpush3.bf16.msra.mxu0 %v4839_v51  ;;  %4118 = vmatpush3.bf16.msra.mxu1 %v4839_v51 }
  0x5a   :  { %3975 = vmatprep.subr.bf16.mxu0 %v4706_v0  ;;  %4119 = vmatprep.subr.bf16.mxu1 %v4706_v0 }
  0x5c   :  { %3144 = vmatmul.mubr.f32.vlgmr.msra.gmra.mrb[0].mxu0 %v177_v39  ;;  %v244_v39 = vand.u32 4294901760, %v243_v11 }
  0x5d   :  { %3977 = vmatpush3.bf16.msra.mxu0 %v4915_v41  ;;  %3178 = vmatprep.mubr.msk.f32.mxu0 %vm4707_vm0, %v4708_v1 }
  0x5e   :  { %3978 = vmatprep.subr.bf16.mxu0 %v4706_v0  ;;  %v4943_v17 = vpack.c.bf16 %v251_v40, %v244_v39 }
  0x61   :  { %3980 = vmatpush3.bf16.msra.mxu0 %v4923_v57 }
  0x62   :  { %3981 = vmatprep.subr.bf16.mxu0 %v4706_v0 }
  0x65   :  { %3983 = vmatpush3.bf16.msra.mxu0 %v4930_v8 }
  0x66   :  { %3984 = vmatprep.subr.bf16.mxu0 %v4706_v0 }
  0x69   :  { %3986 = vmatpush3.bf16.msra.mxu0 %v4937_v16 }
  0x6a   :  { %3987 = vmatprep.subr.bf16.mxu0 %v4706_v0 }
  0x6d   :  { %3989 = vmatpush3.bf16.msra.mxu0 %v4943_v17 }
  0x6e   :  { %3990 = vmatprep.subr.bf16.mxu0 %v4706_v0 }
  0x71   :  { %3992 = vmatpush3.bf16.msra.mxu0 %v4949_v58 }
  0x72   :  { %3993 = vmatprep.subr.bf16.mxu0 %v4706_v0 }
  0x75   :  { %3995 = vmatpush3.bf16.msra.mxu0 %v4954_v6 }
  0x76   :  { %3996 = vmatprep.subr.bf16.mxu0 %v4706_v0 }
  0x79   :  { %3998 = vmatpush3.bf16.msra.mxu0 %v4958_v25 }
  0x7a   :  { %3999 = vmatprep.subr.bf16.mxu0 %v4706_v0 }
  0x7c   :  { %3179 = vmatmul.mubr.f32.vlgmr.msra.gmra.mrb[0].mxu0 %v4805_v31 }
  0x7d   :  { %4001 = vmatpush3.bf16.msra.mxu0 %v4964_v26  ;;  %3213 = vmatprep.mubr.msk.f32.mxu0 %vm4707_vm0, %v4708_v1 }
  0x7e   :  { %4002 = vmatprep.subr.bf16.mxu0 %v4706_v0 }
  0x81   :  { %4004 = vmatpush3.bf16.msra.mxu0 %v4971_v10 }
  0x82   :  { %4005 = vmatprep.subr.bf16.mxu0 %v4706_v0 }
  0x85   :  { %4007 = vmatpush3.bf16.msra.mxu0 %v4979_v34 }
  0x86   :  { %4008 = vmatprep.subr.bf16.mxu0 %v4706_v0 }
  0x89   :  { %4010 = vmatpush3.bf16.msra.mxu0 %v4985_v35 }
  0x8a   :  { %4011 = vmatprep.subr.bf16.mxu0 %v4706_v0 }
  0x8d   :  { %4013 = vmatpush3.bf16.msra.mxu0 %v4991_v43 }
  0x8e   :  { %4014 = vmatprep.subr.bf16.mxu0 %v4706_v0 }
  0x91   :  { %4016 = vmatpush3.bf16.msra.mxu0 %v4997_v47 }
  0x92   :  { %4017 = vmatprep.subr.bf16.mxu0 %v4706_v0 }
  0x95   :  { %4019 = vmatpush3.bf16.msra.mxu0 %v5003_v48 }
  0x96   :  { %4020 = vmatprep.subr.bf16.mxu0 %v4706_v0 }
  0x99   :  { %4022 = vmatpush3.bf16.msra.mxu0 %v5009_v54 }
  0x9a   :  { %4023 = vmatprep.subr.bf16.mxu0 %v4706_v0 }
  0x9c   :  { %3214 = vmatmul.mubr.f32.vlgmr.msra.gmra.mrb[0].mxu0 %v4819_v42  ;;  %v5080_v42 = vld [vmem:[#allocation5] sm:$0xf] }
  0x9d   :  { %4025 = vmatpush3.bf16.msra.mxu0 %v4788_v12  ;;  %3248 = vmatprep.mubr.msk.f32.mxu0 %vm4707_vm0, %v4708_v1 }
  0x9e   :  { %4026 = vmatprep.subr.bf16.mxu0 %v4706_v0 }
  0xa1   :  { %4028 = vmatpush3.bf16.msra.mxu0 %v4791_v13 }
  0xa2   :  { %4029 = vmatprep.subr.bf16.mxu0 %v4706_v0 }
  0xa5   :  { %4031 = vmatpush3.bf16.msra.mxu0 %v4797_v18 }
  0xa6   :  { %4032 = vmatprep.subr.bf16.mxu0 %v4706_v0 }
  0xa9   :  { %4034 = vmatpush3.bf16.msra.mxu0 %v4808_v32 }
  0xaa   :  { %4035 = vmatprep.subr.bf16.mxu0 %v4706_v0 }
  0xad   :  { %4037 = vmatpush3.bf16.msra.mxu0 %v4824_v44 }
  0xae   :  { %4038 = vmatprep.subr.bf16.mxu0 %v4706_v0 }
  0xb1   :  { %4040 = vmatpush3.bf16.msra.mxu0 %v4835_v49 }
  0xb2   :  { %4041 = vmatprep.subr.bf16.mxu0 %v4706_v0 }
  0xb5   :  { %4043 = vmatpush3.bf16.msra.mxu0 %v4837_v50 }
  0xb6   :  { %4044 = vmatprep.subr.bf16.mxu0 %v4706_v0 }
  0xb9   :  { %4046 = vmatpush3.bf16.msra.mxu0 %v4839_v51 }
  0xba   :  { %4047 = vmatprep.subr.bf16.mxu0 %v4706_v0 }
  0xbc   :  { %3249 = vmatmul.mubr.f32.vlgmr.msra.gmra.mrb[0].mxu0 %v175_v52  ;;  %v5084_v52 = vand.u32 4294901760, %v5080_v42 }
  0xbd   :  { %4049 = vmatpush3.bf16.msra.mxu0 %v4893_v27  ;;  %3283 = vmatprep.mubr.msk.f32.mxu0 %vm4707_vm0, %v4708_v1 }
  0xbe   :  { %4050 = vmatprep.subr.bf16.mxu0 %v4706_v0 }
  0xc1   :  { %4052 = vmatpush3.bf16.msra.mxu0 %v4895_v28 }
  0xc2   :  { %4053 = vmatprep.subr.bf16.mxu0 %v4706_v0 }
  0xc5   :  { %4055 = vmatpush3.bf16.msra.mxu0 %v4897_v29 }
  0xc6   :  { %4056 = vmatprep.subr.bf16.mxu0 %v4706_v0 }
  0xc9   :  { %4058 = vmatpush3.bf16.msra.mxu0 %v4900_v30 }
  0xca   :  { %4059 = vmatprep.subr.bf16.mxu0 %v4706_v0 }
  0xcd   :  { %4061 = vmatpush3.bf16.msra.mxu0 %v4902_v33 }
  0xce   :  { %4062 = vmatprep.subr.bf16.mxu0 %v4706_v0 }
  0xd1   :  { %4064 = vmatpush3.bf16.msra.mxu0 %v4904_v36 }
  0xd2   :  { %4065 = vmatprep.subr.bf16.mxu0 %v4706_v0 }
  0xd5   :  { %4067 = vmatpush3.bf16.msra.mxu0 %v4906_v37 }
  0xd6   :  { %4068 = vmatprep.subr.bf16.mxu0 %v4706_v0 }
  0xd9   :  { %4070 = vmatpush3.bf16.msra.mxu0 %v4909_v38 }
  0xda   :  { %4071 = vmatprep.subr.bf16.mxu0 %v4706_v0 }
  0xdc   :  { %3284 = vmatmul.mubr.f32.vlgmr.msra.gmra.mrb[0].mxu0 %v4805_v31 }
  0xdd   :  { %4073 = vmatpush3.bf16.msra.mxu0 %v4788_v12  ;;  %3318 = vmatprep.mubr.msk.f32.mxu0 %vm4707_vm0, %v4708_v1 }
  0xde   :  { %4074 = vmatprep.subr.bf16.mxu0 %v4706_v0 }
  0xe1   :  { %4076 = vmatpush3.bf16.msra.mxu0 %v4791_v13 }
  0xe2   :  { %4077 = vmatprep.subr.bf16.mxu0 %v4706_v0 }
  0xe5   :  { %4079 = vmatpush3.bf16.msra.mxu0 %v4797_v18 }
  0xe6   :  { %4080 = vmatprep.subr.bf16.mxu0 %v4706_v0 }
  0xe9   :  { %4082 = vmatpush3.bf16.msra.mxu0 %v4808_v32 }
  0xea   :  { %4083 = vmatprep.subr.bf16.mxu0 %v4706_v0 }
  0xed   :  { %4085 = vmatpush3.bf16.msra.mxu0 %v4824_v44 }
  0xee   :  { %4086 = vmatprep.subr.bf16.mxu0 %v4706_v0 }
  0xf1   :  { %4088 = vmatpush3.bf16.msra.mxu0 %v4835_v49 }
  0xf2   :  { %4089 = vmatprep.subr.bf16.mxu0 %v4706_v0 }
  0xf5   :  { %4091 = vmatpush3.bf16.msra.mxu0 %v4837_v50 }
  0xf6   :  { %4092 = vmatprep.subr.bf16.mxu0 %v4706_v0 }
  0xf9   :  { %4094 = vmatpush3.bf16.msra.mxu0 %v4839_v51 }
  0xfa   :  { %4239 = vmatprep.subr.bf16.mxu0 %v4706_v0 }
  0xfc   :  { %3319 = vmatmul.mubr.f32.vlgmr.msra.gmra.mrb[0].mxu0 %v4805_v31  ;;  %v5090_v31 = vsub.f32 %v5080_v42, %v5084_v52 }
  0xfd   :  { %4241 = vmatpush3.bf16.msra.mxu0 %v4788_v12  ;;  %3563 = vmatprep.mubr.msk.f32.mxu0 %vm4707_vm0, %v4708_v1 }
  0xfe   :  { %4242 = vmatprep.subr.bf16.mxu0 %v4706_v0  ;;  %v1465_v55 = vand.u32 4294901760, %v5090_v31 }
 0x100   :  { %v1466_v59 = vsub.f32 %v5090_v31, %v1465_v55 }
 0x101   :  { %4244 = vmatpush3.bf16.msra.mxu0 %v4791_v13 }
 0x102   :  { %4245 = vmatprep.subr.bf16.mxu0 %v4706_v0  ;;  %v1467_v61 = vand.u32 4294901760, %v1466_v59 }
 0x105   :  { %4247 = vmatpush3.bf16.msra.mxu0 %v4797_v18 }
 0x106   :  { %4248 = vmatprep.subr.bf16.mxu0 %v4706_v0 }
 0x109   :  { %4250 = vmatpush3.bf16.msra.mxu0 %v4808_v32 }
 0x10a   :  { %4251 = vmatprep.subr.bf16.mxu0 %v4706_v0 }
 0x10d   :  { %4253 = vmatpush3.bf16.msra.mxu0 %v4824_v44 }
 0x10e   :  { %4254 = vmatprep.subr.bf16.mxu0 %v4706_v0 }
 0x111   :  { %4256 = vmatpush3.bf16.msra.mxu0 %v4835_v49 }
 0x112   :  { %4257 = vmatprep.subr.bf16.mxu0 %v4706_v0 }
 0x115   :  { %4259 = vmatpush3.bf16.msra.mxu0 %v4837_v50 }
 0x116   :  { %4260 = vmatprep.subr.bf16.mxu0 %v4706_v0 }
 0x119   :  { %4262 = vmatpush3.bf16.msra.mxu0 %v4839_v51 }
 0x11a   :  { %4263 = vmatprep.subr.bf16.mxu0 %v4706_v0 }
 0x11c   :  { %3564 = vmatmul.mubr.f32.vlgmr.msra.gmra.mrb[2].mxu0 %v1467_v61 }
 0x11d   :  { %4265 = vmatpush3.bf16.msra.mxu0 %v4915_v41  ;;  %3598 = vmatprep.mubr.msk.f32.mxu0 %vm4707_vm0, %v4708_v1 }
 0x11e   :  { %4266 = vmatprep.subr.bf16.mxu0 %v4706_v0 }
 0x121   :  { %4268 = vmatpush3.bf16.msra.mxu0 %v4923_v57 }
 0x122   :  { %4269 = vmatprep.subr.bf16.mxu0 %v4706_v0 }
 0x125   :  { %4271 = vmatpush3.bf16.msra.mxu0 %v4930_v8 }
 0x126   :  { %4272 = vmatprep.subr.bf16.mxu0 %v4706_v0 }
 0x129   :  { %4274 = vmatpush3.bf16.msra.mxu0 %v4937_v16 }
 0x12a   :  { %4275 = vmatprep.subr.bf16.mxu0 %v4706_v0 }
 0x12d   :  { %4277 = vmatpush3.bf16.msra.mxu0 %v4943_v17 }
 0x12e   :  { %4278 = vmatprep.subr.bf16.mxu0 %v4706_v0 }
 0x131   :  { %4280 = vmatpush3.bf16.msra.mxu0 %v4949_v58 }
 0x132   :  { %4281 = vmatprep.subr.bf16.mxu0 %v4706_v0 }
 0x135   :  { %4283 = vmatpush3.bf16.msra.mxu0 %v4954_v6 }
 0x136   :  { %4284 = vmatprep.subr.bf16.mxu0 %v4706_v0 }
 0x139   :  { %4286 = vmatpush3.bf16.msra.mxu0 %v4958_v25 }
 0x13a   :  { %4287 = vmatprep.subr.bf16.mxu0 %v4706_v0 }
 0x13c   :  { %3599 = vmatmul.mubr.f32.vlgmr.msra.gmra.mrb[2].mxu0 %v5084_v52 }
 0x13d   :  { %4289 = vmatpush3.bf16.msra.mxu0 %v4964_v26  ;;  %3633 = vmatprep.mubr.msk.f32.mxu0 %vm4707_vm0, %v4708_v1 }
 0x13e   :  { %4290 = vmatprep.subr.bf16.mxu0 %v4706_v0 }
 0x141   :  { %4292 = vmatpush3.bf16.msra.mxu0 %v4971_v10 }
 0x142   :  { %4293 = vmatprep.subr.bf16.mxu0 %v4706_v0 }
 0x145   :  { %4295 = vmatpush3.bf16.msra.mxu0 %v4979_v34 }
 0x146   :  { %4296 = vmatprep.subr.bf16.mxu0 %v4706_v0 }
 0x149   :  { %4298 = vmatpush3.bf16.msra.mxu0 %v4985_v35 }
 0x14a   :  { %4299 = vmatprep.subr.bf16.mxu0 %v4706_v0 }
 0x14d   :  { %4301 = vmatpush3.bf16.msra.mxu0 %v4991_v43 }
 0x14e   :  { %4302 = vmatprep.subr.bf16.mxu0 %v4706_v0 }
 0x151   :  { %4304 = vmatpush3.bf16.msra.mxu0 %v4997_v47 }
 0x152   :  { %4305 = vmatprep.subr.bf16.mxu0 %v4706_v0 }
 0x155   :  { %4307 = vmatpush3.bf16.msra.mxu0 %v5003_v48 }
 0x156   :  { %4308 = vmatprep.subr.bf16.mxu0 %v4706_v0 }
 0x159   :  { %4310 = vmatpush3.bf16.msra.mxu0 %v5009_v54 }
 0x15a   :  { %4311 = vmatprep.subr.bf16.mxu0 %v4706_v0 }
 0x15c   :  { %3634 = vmatmul.mubr.f32.vlgmr.msra.gmra.mrb[2].mxu0 %v5090_v31 }
 0x15d   :  { %4313 = vmatpush3.bf16.msra.mxu0 %v4788_v12  ;;  %3668 = vmatprep.mubr.msk.f32.mxu0 %vm4707_vm0, %v4708_v1 }
 0x15e   :  { %4314 = vmatprep.subr.bf16.mxu0 %v4706_v0 }
 0x161   :  { %4316 = vmatpush3.bf16.msra.mxu0 %v4791_v13 }
 0x162   :  { %4317 = vmatprep.subr.bf16.mxu0 %v4706_v0 }
 0x165   :  { %4319 = vmatpush3.bf16.msra.mxu0 %v4797_v18 }
 0x166   :  { %4320 = vmatprep.subr.bf16.mxu0 %v4706_v0 }
 0x169   :  { %4322 = vmatpush3.bf16.msra.mxu0 %v4808_v32 }
 0x16a   :  { %4323 = vmatprep.subr.bf16.mxu0 %v4706_v0 }
 0x16d   :  { %4325 = vmatpush3.bf16.msra.mxu0 %v4824_v44 }
 0x16e   :  { %4326 = vmatprep.subr.bf16.mxu0 %v4706_v0 }
 0x171   :  { %4328 = vmatpush3.bf16.msra.mxu0 %v4835_v49 }
 0x172   :  { %4329 = vmatprep.subr.bf16.mxu0 %v4706_v0 }
 0x175   :  { %4331 = vmatpush3.bf16.msra.mxu0 %v4837_v50 }
 0x176   :  { %4332 = vmatprep.subr.bf16.mxu0 %v4706_v0 }
 0x179   :  { %4334 = vmatpush3.bf16.msra.mxu0 %v4839_v51 }
 0x17a   :  { %4335 = vmatprep.subr.bf16.mxu0 %v4706_v0 }
 0x17c   :  { %3669 = vmatmul.mubr.f32.vlgmr.msra.gmra.mrb[2].mxu0 %v1465_v55 }
 0x17d   :  { %4337 = vmatpush3.bf16.msra.mxu0 %v4893_v27  ;;  %3703 = vmatprep.mubr.msk.f32.mxu0 %vm4707_vm0, %v4708_v1 }
 0x17e   :  { %4338 = vmatprep.subr.bf16.mxu0 %v4706_v0 }
 0x181   :  { %4340 = vmatpush3.bf16.msra.mxu0 %v4895_v28 }
 0x182   :  { %4341 = vmatprep.subr.bf16.mxu0 %v4706_v0 }
 0x185   :  { %4343 = vmatpush3.bf16.msra.mxu0 %v4897_v29 }
 0x186   :  { %4344 = vmatprep.subr.bf16.mxu0 %v4706_v0 }
 0x189   :  { %4346 = vmatpush3.bf16.msra.mxu0 %v4900_v30 }
 0x18a   :  { %4347 = vmatprep.subr.bf16.mxu0 %v4706_v0 }
 0x18d   :  { %4349 = vmatpush3.bf16.msra.mxu0 %v4902_v33 }
 0x18e   :  { %4350 = vmatprep.subr.bf16.mxu0 %v4706_v0 }
 0x191   :  { %4352 = vmatpush3.bf16.msra.mxu0 %v4904_v36 }
 0x192   :  { %4353 = vmatprep.subr.bf16.mxu0 %v4706_v0 }
 0x195   :  { %4355 = vmatpush3.bf16.msra.mxu0 %v4906_v37 }
 0x196   :  { %4356 = vmatprep.subr.bf16.mxu0 %v4706_v0 }
 0x199   :  { %4358 = vmatpush3.bf16.msra.mxu0 %v4909_v38 }
 0x19a   :  { %4359 = vmatprep.subr.bf16.mxu0 %v4706_v0 }
 0x19c   :  { %3704 = vmatmul.mubr.f32.vlgmr.msra.gmra.mrb[2].mxu0 %v5084_v52 }
 0x19d   :  { %4361 = vmatpush3.bf16.msra.mxu0 %v4788_v12  ;;  %3738 = vmatprep.mubr.msk.f32.mxu0 %vm4707_vm0, %v4708_v1 }
 0x19e   :  { %4362 = vmatprep.subr.bf16.mxu0 %v4706_v0 }
 0x1a1   :  { %4364 = vmatpush3.bf16.msra.mxu0 %v4791_v13 }
 0x1a2   :  { %4365 = vmatprep.subr.bf16.mxu0 %v4706_v0 }
 0x1a5   :  { %4367 = vmatpush3.bf16.msra.mxu0 %v4797_v18 }
 0x1a6   :  { %4368 = vmatprep.subr.bf16.mxu0 %v4706_v0 }
 0x1a9   :  { %4370 = vmatpush3.bf16.msra.mxu0 %v4808_v32 }
 0x1aa   :  { %4371 = vmatprep.subr.bf16.mxu0 %v4706_v0 }
 0x1ad   :  { %4373 = vmatpush3.bf16.msra.mxu0 %v4824_v44 }
 0x1ae   :  { %4374 = vmatprep.subr.bf16.mxu0 %v4706_v0 }
 0x1b1   :  { %4376 = vmatpush3.bf16.msra.mxu0 %v4835_v49 }
 0x1b2   :  { %4377 = vmatprep.subr.bf16.mxu0 %v4706_v0 }
 0x1b5   :  { %4379 = vmatpush3.bf16.msra.mxu0 %v4837_v50 }
 0x1b6   :  { %4380 = vmatprep.subr.bf16.mxu0 %v4706_v0 }
 0x1b9   :  { %4382 = vmatpush3.bf16.msra.mxu0 %v4839_v51 }
 0x1bc   :  { %3739 = vmatmul.mubr.f32.vlgmr.msra.gmra.mrb[2].mxu0 %v5084_v52 }
 0x1cf   :  { %v729_v62 = vpop.f32.mrb[0].mxu0 }
 0x1d0   :  { %v5196_v63 = vsub.f32 %v4799_v22, %v729_v62  ;;  %v3320_v2 = vpop.f32.mrb[1].mxu0 }
 0x1d2   :  { %v734_v3 = vmul.f32 %v5196_v63, %v5196_v63 }
 0x1d4   :  { %v5200_v4 = vand.u32 4294901760, %v734_v3 }
 0x1d6   :  { %v817_v5 = vsub.f32 %v734_v3, %v5200_v4 }
 0x1d8   :  { %v818_v9 = vand.u32 4294901760, %v817_v5 }
 0x1da   :  { %v819_v11 = vsub.f32 %v817_v5, %v818_v9 }
 0x1dc   :  { %v820_v14 = vand.u32 4294901760, %v819_v11 }
 0x1de   :  { %3354 = vmatmul.mubr.f32.vlgmr.msra.gmra.mrb[0].mxu1 %v820_v14 }
 0x1df   :  { %4121 = vmatpush3.bf16.msra.mxu1 %v4915_v41  ;;  %3388 = vmatprep.mubr.msk.f32.mxu1 %vm4707_vm0, %v4708_v1 }
 0x1e0   :  { %4122 = vmatprep.subr.bf16.mxu1 %v4706_v0 }
 0x1e3   :  { %4124 = vmatpush3.bf16.msra.mxu1 %v4923_v57 }
 0x1e4   :  { %4125 = vmatprep.subr.bf16.mxu1 %v4706_v0 }
 0x1e7   :  { %4127 = vmatpush3.bf16.msra.mxu1 %v4930_v8 }
 0x1e8   :  { %4128 = vmatprep.subr.bf16.mxu1 %v4706_v0 }
 0x1eb   :  { %4130 = vmatpush3.bf16.msra.mxu1 %v4937_v16 }
 0x1ec   :  { %4131 = vmatprep.subr.bf16.mxu1 %v4706_v0 }
 0x1ef   :  { %4133 = vmatpush3.bf16.msra.mxu1 %v4943_v17 }
 0x1f0   :  { %4134 = vmatprep.subr.bf16.mxu1 %v4706_v0 }
 0x1f3   :  { %4136 = vmatpush3.bf16.msra.mxu1 %v4949_v58 }
 0x1f4   :  { %4137 = vmatprep.subr.bf16.mxu1 %v4706_v0 }
 0x1f7   :  { %4139 = vmatpush3.bf16.msra.mxu1 %v4954_v6 }
 0x1f8   :  { %4140 = vmatprep.subr.bf16.mxu1 %v4706_v0 }
 0x1fb   :  { %4142 = vmatpush3.bf16.msra.mxu1 %v4958_v25 }
 0x1fc   :  { %4143 = vmatprep.subr.bf16.mxu1 %v4706_v0 }
 0x1fe   :  { %3389 = vmatmul.mubr.f32.vlgmr.msra.gmra.mrb[0].mxu1 %v5200_v4 }
 0x1ff   :  { %4145 = vmatpush3.bf16.msra.mxu1 %v4964_v26  ;;  %3423 = vmatprep.mubr.msk.f32.mxu1 %vm4707_vm0, %v4708_v1 }
 0x200   :  { %4146 = vmatprep.subr.bf16.mxu1 %v4706_v0 }
 0x203   :  { %4148 = vmatpush3.bf16.msra.mxu1 %v4971_v10 }
 0x204   :  { %4149 = vmatprep.subr.bf16.mxu1 %v4706_v0 }
 0x207   :  { %4151 = vmatpush3.bf16.msra.mxu1 %v4979_v34 }
 0x208   :  { %4152 = vmatprep.subr.bf16.mxu1 %v4706_v0 }
 0x20b   :  { %4154 = vmatpush3.bf16.msra.mxu1 %v4985_v35 }
 0x20c   :  { %4155 = vmatprep.subr.bf16.mxu1 %v4706_v0 }
 0x20f   :  { %4157 = vmatpush3.bf16.msra.mxu1 %v4991_v43 }
 0x210   :  { %4158 = vmatprep.subr.bf16.mxu1 %v4706_v0 }
 0x213   :  { %4160 = vmatpush3.bf16.msra.mxu1 %v4997_v47 }
 0x214   :  { %4161 = vmatprep.subr.bf16.mxu1 %v4706_v0 }
 0x217   :  { %4163 = vmatpush3.bf16.msra.mxu1 %v5003_v48 }
 0x218   :  { %4164 = vmatprep.subr.bf16.mxu1 %v4706_v0 }
 0x21b   :  { %4166 = vmatpush3.bf16.msra.mxu1 %v5009_v54 }
 0x21c   :  { %4167 = vmatprep.subr.bf16.mxu1 %v4706_v0 }
 0x21e   :  { %3424 = vmatmul.mubr.f32.vlgmr.msra.gmra.mrb[0].mxu1 %v817_v5 }
 0x21f   :  { %4169 = vmatpush3.bf16.msra.mxu1 %v4788_v12  ;;  %3458 = vmatprep.mubr.msk.f32.mxu1 %vm4707_vm0, %v4708_v1 }
 0x220   :  { %4170 = vmatprep.subr.bf16.mxu1 %v4706_v0 }
 0x223   :  { %4172 = vmatpush3.bf16.msra.mxu1 %v4791_v13 }
 0x224   :  { %4173 = vmatprep.subr.bf16.mxu1 %v4706_v0 }
 0x227   :  { %4175 = vmatpush3.bf16.msra.mxu1 %v4797_v18 }
 0x228   :  { %4176 = vmatprep.subr.bf16.mxu1 %v4706_v0 }
 0x22b   :  { %4178 = vmatpush3.bf16.msra.mxu1 %v4808_v32 }
 0x22c   :  { %4179 = vmatprep.subr.bf16.mxu1 %v4706_v0 }
 0x22f   :  { %4181 = vmatpush3.bf16.msra.mxu1 %v4824_v44 }
 0x230   :  { %4182 = vmatprep.subr.bf16.mxu1 %v4706_v0 }
 0x233   :  { %4184 = vmatpush3.bf16.msra.mxu1 %v4835_v49 }
 0x234   :  { %4185 = vmatprep.subr.bf16.mxu1 %v4706_v0 }
 0x237   :  { %4187 = vmatpush3.bf16.msra.mxu1 %v4837_v50 }
 0x238   :  { %4188 = vmatprep.subr.bf16.mxu1 %v4706_v0 }
 0x23b   :  { %4190 = vmatpush3.bf16.msra.mxu1 %v4839_v51 }
 0x23c   :  { %4191 = vmatprep.subr.bf16.mxu1 %v4706_v0 }
 0x23e   :  { %3459 = vmatmul.mubr.f32.vlgmr.msra.gmra.mrb[0].mxu1 %v818_v9 }
 0x23f   :  { %4193 = vmatpush3.bf16.msra.mxu1 %v4893_v27  ;;  %3493 = vmatprep.mubr.msk.f32.mxu1 %vm4707_vm0, %v4708_v1 }
 0x240   :  { %4194 = vmatprep.subr.bf16.mxu1 %v4706_v0 }
 0x243   :  { %4196 = vmatpush3.bf16.msra.mxu1 %v4895_v28 }
 0x244   :  { %4197 = vmatprep.subr.bf16.mxu1 %v4706_v0 }
 0x247   :  { %4199 = vmatpush3.bf16.msra.mxu1 %v4897_v29 }
 0x248   :  { %4200 = vmatprep.subr.bf16.mxu1 %v4706_v0 }
 0x24b   :  { %4202 = vmatpush3.bf16.msra.mxu1 %v4900_v30 }
 0x24c   :  { %4203 = vmatprep.subr.bf16.mxu1 %v4706_v0 }
 0x24f   :  { %4205 = vmatpush3.bf16.msra.mxu1 %v4902_v33 }
 0x250   :  { %4206 = vmatprep.subr.bf16.mxu1 %v4706_v0 }
 0x253   :  { %4208 = vmatpush3.bf16.msra.mxu1 %v4904_v36 }
 0x254   :  { %4209 = vmatprep.subr.bf16.mxu1 %v4706_v0 }
 0x257   :  { %4211 = vmatpush3.bf16.msra.mxu1 %v4906_v37 }
 0x258   :  { %4212 = vmatprep.subr.bf16.mxu1 %v4706_v0 }
 0x25b   :  { %4214 = vmatpush3.bf16.msra.mxu1 %v4909_v38 }
 0x25c   :  { %4215 = vmatprep.subr.bf16.mxu1 %v4706_v0 }
 0x25e   :  { %3494 = vmatmul.mubr.f32.vlgmr.msra.gmra.mrb[0].mxu1 %v5200_v4 }
 0x25f   :  { %4217 = vmatpush3.bf16.msra.mxu1 %v4788_v12  ;;  %3528 = vmatprep.mubr.msk.f32.mxu1 %vm4707_vm0, %v4708_v1 }
 0x260   :  { %4218 = vmatprep.subr.bf16.mxu1 %v4706_v0 }
 0x263   :  { %4220 = vmatpush3.bf16.msra.mxu1 %v4791_v13 }
 0x264   :  { %4221 = vmatprep.subr.bf16.mxu1 %v4706_v0 }
 0x267   :  { %4223 = vmatpush3.bf16.msra.mxu1 %v4797_v18 }
 0x268   :  { %4224 = vmatprep.subr.bf16.mxu1 %v4706_v0 }
 0x26b   :  { %4226 = vmatpush3.bf16.msra.mxu1 %v4808_v32 }
 0x26c   :  { %4227 = vmatprep.subr.bf16.mxu1 %v4706_v0 }
 0x26f   :  { %4229 = vmatpush3.bf16.msra.mxu1 %v4824_v44 }
 0x270   :  { %4230 = vmatprep.subr.bf16.mxu1 %v4706_v0 }
 0x273   :  { %4232 = vmatpush3.bf16.msra.mxu1 %v4835_v49 }
 0x274   :  { %4233 = vmatprep.subr.bf16.mxu1 %v4706_v0 }
 0x277   :  { %4235 = vmatpush3.bf16.msra.mxu1 %v4837_v50 }
 0x278   :  { %4236 = vmatprep.subr.bf16.mxu1 %v4706_v0 }
 0x27b   :  { %4238 = vmatpush3.bf16.msra.mxu1 %v4839_v51 }
 0x27c   :  { %4383 = vmatprep.subr.bf16.mxu1 %v4706_v0 }
 0x27e   :  { %3529 = vmatmul.mubr.f32.vlgmr.msra.gmra.mrb[0].mxu1 %v5200_v4 }
 0x27f   :  { %4385 = vmatpush3.bf16.msra.mxu1 %v4788_v12  ;;  %3773 = vmatprep.mubr.msk.f32.mxu1 %vm4707_vm0, %v4708_v1 }
 0x280   :  { %4386 = vmatprep.subr.bf16.mxu1 %v4706_v0 }
 0x283   :  { %4388 = vmatpush3.bf16.msra.mxu1 %v4791_v13 }
 0x284   :  { %4389 = vmatprep.subr.bf16.mxu1 %v4706_v0 }
 0x287   :  { %4391 = vmatpush3.bf16.msra.mxu1 %v4797_v18 }
 0x288   :  { %4392 = vmatprep.subr.bf16.mxu1 %v4706_v0 }
 0x28b   :  { %4394 = vmatpush3.bf16.msra.mxu1 %v4808_v32 }
 0x28c   :  { %4395 = vmatprep.subr.bf16.mxu1 %v4706_v0 }
 0x28f   :  { %4397 = vmatpush3.bf16.msra.mxu1 %v4824_v44  ;;  %v2019_v22 = vpop.f32.mrb[2].mxu0 }
 0x290   :  { %v5308_v15 = vsub.f32 %v5080_v42, %v2019_v22  ;;  %v3740_v39 = vpop.f32.mrb[3].mxu0  ;;  %4398 = vmatprep.subr.bf16.mxu1 %v4706_v0 }
 0x292   :  { %v2024_v40 = vmul.f32 %v5308_v15, %v5308_v15 }
 0x293   :  { %4400 = vmatpush3.bf16.msra.mxu1 %v4835_v49 }
 0x294   :  { %v5314_v45 = vand.u32 4294901760, %v2024_v40  ;;  %4401 = vmatprep.subr.bf16.mxu1 %v4706_v0 }
 0x296   :  { %v2107_v46 = vsub.f32 %v2024_v40, %v5314_v45 }
 0x297   :  { %4403 = vmatpush3.bf16.msra.mxu1 %v4837_v50 }
 0x298   :  { %v2108_v19 = vand.u32 4294901760, %v2107_v46  ;;  %4404 = vmatprep.subr.bf16.mxu1 %v4706_v0 }
 0x29a   :  { %v2109_v53 = vsub.f32 %v2107_v46, %v2108_v19 }
 0x29b   :  { %4406 = vmatpush3.bf16.msra.mxu1 %v4839_v51 }
 0x29c   :  { %4407 = vmatprep.subr.bf16.mxu1 %v4706_v0  ;;  %v2110_v20 = vand.u32 4294901760, %v2109_v53 }
 0x29e   :  { %3774 = vmatmul.mubr.f32.vlgmr.msra.gmra.mrb[2].mxu1 %v2110_v20 }
 0x29f   :  { %4409 = vmatpush3.bf16.msra.mxu1 %v4915_v41  ;;  %3808 = vmatprep.mubr.msk.f32.mxu1 %vm4707_vm0, %v4708_v1 }
 0x2a0   :  { %4410 = vmatprep.subr.bf16.mxu1 %v4706_v0 }
 0x2a3   :  { %4412 = vmatpush3.bf16.msra.mxu1 %v4923_v57 }
 0x2a4   :  { %4413 = vmatprep.subr.bf16.mxu1 %v4706_v0 }
 0x2a7   :  { %4415 = vmatpush3.bf16.msra.mxu1 %v4930_v8 }
 0x2a8   :  { %4416 = vmatprep.subr.bf16.mxu1 %v4706_v0 }
 0x2ab   :  { %4418 = vmatpush3.bf16.msra.mxu1 %v4937_v16 }
 0x2ac   :  { %4419 = vmatprep.subr.bf16.mxu1 %v4706_v0 }
 0x2af   :  { %4421 = vmatpush3.bf16.msra.mxu1 %v4943_v17 }
 0x2b0   :  { %4422 = vmatprep.subr.bf16.mxu1 %v4706_v0 }
 0x2b3   :  { %4424 = vmatpush3.bf16.msra.mxu1 %v4949_v58 }
 0x2b4   :  { %4425 = vmatprep.subr.bf16.mxu1 %v4706_v0 }
 0x2b7   :  { %4427 = vmatpush3.bf16.msra.mxu1 %v4954_v6 }
 0x2b8   :  { %4428 = vmatprep.subr.bf16.mxu1 %v4706_v0 }
 0x2bb   :  { %4430 = vmatpush3.bf16.msra.mxu1 %v4958_v25 }
 0x2bc   :  { %4431 = vmatprep.subr.bf16.mxu1 %v4706_v0 }
 0x2be   :  { %3809 = vmatmul.mubr.f32.vlgmr.msra.gmra.mrb[2].mxu1 %v5314_v45 }
 0x2bf   :  { %4433 = vmatpush3.bf16.msra.mxu1 %v4964_v26  ;;  %3843 = vmatprep.mubr.msk.f32.mxu1 %vm4707_vm0, %v4708_v1 }
 0x2c0   :  { %4434 = vmatprep.subr.bf16.mxu1 %v4706_v0 }
 0x2c3   :  { %4436 = vmatpush3.bf16.msra.mxu1 %v4971_v10 }
 0x2c4   :  { %4437 = vmatprep.subr.bf16.mxu1 %v4706_v0 }
 0x2c7   :  { %4439 = vmatpush3.bf16.msra.mxu1 %v4979_v34 }
 0x2c8   :  { %4440 = vmatprep.subr.bf16.mxu1 %v4706_v0 }
 0x2cb   :  { %4442 = vmatpush3.bf16.msra.mxu1 %v4985_v35 }
 0x2cc   :  { %4443 = vmatprep.subr.bf16.mxu1 %v4706_v0 }
 0x2cf   :  { %4445 = vmatpush3.bf16.msra.mxu1 %v4991_v43 }
 0x2d0   :  { %4446 = vmatprep.subr.bf16.mxu1 %v4706_v0 }
 0x2d3   :  { %4448 = vmatpush3.bf16.msra.mxu1 %v4997_v47 }
 0x2d4   :  { %4449 = vmatprep.subr.bf16.mxu1 %v4706_v0 }
 0x2d7   :  { %4451 = vmatpush3.bf16.msra.mxu1 %v5003_v48 }
 0x2d8   :  { %4452 = vmatprep.subr.bf16.mxu1 %v4706_v0 }
 0x2db   :  { %4454 = vmatpush3.bf16.msra.mxu1 %v5009_v54 }
 0x2dc   :  { %4455 = vmatprep.subr.bf16.mxu1 %v4706_v0 }
 0x2de   :  { %3844 = vmatmul.mubr.f32.vlgmr.msra.gmra.mrb[2].mxu1 %v2107_v46 }
 0x2df   :  { %4457 = vmatpush3.bf16.msra.mxu1 %v4788_v12  ;;  %3878 = vmatprep.mubr.msk.f32.mxu1 %vm4707_vm0, %v4708_v1 }
 0x2e0   :  { %4458 = vmatprep.subr.bf16.mxu1 %v4706_v0 }
 0x2e3   :  { %4460 = vmatpush3.bf16.msra.mxu1 %v4791_v13 }
 0x2e4   :  { %4461 = vmatprep.subr.bf16.mxu1 %v4706_v0 }
 0x2e7   :  { %4463 = vmatpush3.bf16.msra.mxu1 %v4797_v18 }
 0x2e8   :  { %4464 = vmatprep.subr.bf16.mxu1 %v4706_v0 }
 0x2eb   :  { %4466 = vmatpush3.bf16.msra.mxu1 %v4808_v32 }
 0x2ec   :  { %4467 = vmatprep.subr.bf16.mxu1 %v4706_v0 }
 0x2ef   :  { %4469 = vmatpush3.bf16.msra.mxu1 %v4824_v44 }
 0x2f0   :  { %4470 = vmatprep.subr.bf16.mxu1 %v4706_v0 }
 0x2f3   :  { %4472 = vmatpush3.bf16.msra.mxu1 %v4835_v49 }
 0x2f4   :  { %4473 = vmatprep.subr.bf16.mxu1 %v4706_v0 }
 0x2f7   :  { %4475 = vmatpush3.bf16.msra.mxu1 %v4837_v50 }
 0x2f8   :  { %4476 = vmatprep.subr.bf16.mxu1 %v4706_v0 }
 0x2fb   :  { %4478 = vmatpush3.bf16.msra.mxu1 %v4839_v51 }
 0x2fc   :  { %4479 = vmatprep.subr.bf16.mxu1 %v4706_v0 }
 0x2fe   :  { %3879 = vmatmul.mubr.f32.vlgmr.msra.gmra.mrb[2].mxu1 %v2108_v19 }
 0x2ff   :  { %4481 = vmatpush3.bf16.msra.mxu1 %v4893_v27  ;;  %3913 = vmatprep.mubr.msk.f32.mxu1 %vm4707_vm0, %v4708_v1 }
 0x300   :  { %4482 = vmatprep.subr.bf16.mxu1 %v4706_v0 }
 0x303   :  { %4484 = vmatpush3.bf16.msra.mxu1 %v4895_v28 }
 0x304   :  { %4485 = vmatprep.subr.bf16.mxu1 %v4706_v0 }
 0x307   :  { %4487 = vmatpush3.bf16.msra.mxu1 %v4897_v29 }
 0x308   :  { %4488 = vmatprep.subr.bf16.mxu1 %v4706_v0 }
 0x30b   :  { %4490 = vmatpush3.bf16.msra.mxu1 %v4900_v30 }
 0x30c   :  { %4491 = vmatprep.subr.bf16.mxu1 %v4706_v0 }
 0x30f   :  { %4493 = vmatpush3.bf16.msra.mxu1 %v4902_v33 }
 0x310   :  { %4494 = vmatprep.subr.bf16.mxu1 %v4706_v0 }
 0x313   :  { %4496 = vmatpush3.bf16.msra.mxu1 %v4904_v36 }
 0x314   :  { %4497 = vmatprep.subr.bf16.mxu1 %v4706_v0 }
 0x317   :  { %4499 = vmatpush3.bf16.msra.mxu1 %v4906_v37 }
 0x318   :  { %4500 = vmatprep.subr.bf16.mxu1 %v4706_v0 }
 0x31b   :  { %4502 = vmatpush3.bf16.msra.mxu1 %v4909_v38 }
 0x31c   :  { %4503 = vmatprep.subr.bf16.mxu1 %v4706_v0 }
 0x31e   :  { %3914 = vmatmul.mubr.f32.vlgmr.msra.gmra.mrb[2].mxu1 %v5314_v45 }
 0x31f   :  { %4505 = vmatpush3.bf16.msra.mxu1 %v4788_v12  ;;  %3948 = vmatprep.mubr.msk.f32.mxu1 %vm4707_vm0, %v4708_v1 }
 0x320   :  { %4506 = vmatprep.subr.bf16.mxu1 %v4706_v0 }
 0x323   :  { %4508 = vmatpush3.bf16.msra.mxu1 %v4791_v13 }
 0x324   :  { %4509 = vmatprep.subr.bf16.mxu1 %v4706_v0 }
 0x327   :  { %4511 = vmatpush3.bf16.msra.mxu1 %v4797_v18 }
 0x328   :  { %4512 = vmatprep.subr.bf16.mxu1 %v4706_v0 }
 0x32b   :  { %4514 = vmatpush3.bf16.msra.mxu1 %v4808_v32  ;;  %v2701_v32 = vld [vmem:[%s5448_s2] ss:$0 sm:$0xff] }
 0x32c   :  { %4515 = vmatprep.subr.bf16.mxu1 %v4706_v0 }
 0x32f   :  { %4517 = vmatpush3.bf16.msra.mxu1 %v4824_v44 }
 0x330   :  { %4518 = vmatprep.subr.bf16.mxu1 %v4706_v0 }
 0x333   :  { %4520 = vmatpush3.bf16.msra.mxu1 %v4835_v49  ;;  %v2702_v49 = vld [vmem:[%s5449_s3] ss:$0 sm:$0xff] }
 0x334   :  { %4521 = vmatprep.subr.bf16.mxu1 %v4706_v0 }
 0x337   :  { %4523 = vmatpush3.bf16.msra.mxu1 %v4837_v50 }
 0x338   :  { %4524 = vmatprep.subr.bf16.mxu1 %v4706_v0 }
 0x33b   :  { %4526 = vmatpush3.bf16.msra.mxu1 %v4839_v51 }
 0x33e   :  { %3949 = vmatmul.mubr.f32.vlgmr.msra.gmra.mrb[2].mxu1 %v5314_v45 }
 0x351   :  { %v1372_v1 = vpop.f32.mrb[0].mxu1 }
 0x352   :  { %v4527_v12 = vadd.f32 1e-05, %v1372_v1  ;;  %v3530_v13 = vpop.f32.mrb[1].mxu1 }
 0x354   :  { %4579 = vrsqrt.f32 %v4527_v12 }
 0x35e   :  { %v4580_v18 = vpop.eup %4579 }
 0x35f   :  { %v1377_v44 = vmul.f32 %v4580_v18, %v5196_v63 }
 0x361   :  { %v1378_v0 = vmul.f32 %v2701_v32, %v1377_v44 }
 0x363   :  { %v1379_v50 = vadd.f32 %v2702_v49, %v1378_v0 }
 0x365   :  { %1380 = vst [vmem:[#allocation8] sm:$0xf] %v1379_v50 }
 0x366   :  { %4660 = shalt.err (!%p4657_p0)
}
 0x367   :  { %s4661_s16 = scalar_lea.hbm %s5451_s5, 64 }
 0x368   :  { %p4662_p1 = scmp.ne.s32.totalorder %s5451_s5, %s4661_s16  ;;  %p4665_p2 = scmp.lt.u32.totalorder %s4661_s16, %s5451_s5 }
 0x36a   :  { %p4667_p3 = pnand %p4665_p2, %p4662_p1 }
 0x36c   :  { %4670 = shalt.err (!%p4667_p3)
}
 0x36d   :  { %2680 = dma.vmem_to_hbm [thread:$0]  %s2678_s13, 64, %s5451_s5, [#allocation4]  }
 0x36e   :  { %s4710_s21 = smov [#allocation9]  }
 0x36f   :  { %s2687_s22 = sshll.u32 %s4710_s21, 4  ;;  %s2688_s22 = int_to_ptr.vmem [resolvable:$true] %s2687_s22 }
 0x370   :  { %s4671_s23 = scalar_lea.vmem %s2688_s22, 64  ;;  %p4676_p5 = scmp.lt.s32.totalorder %s2688_s22, %s2688_s22 }
 0x371   :  { %p4672_p4 = scmp.ne.s32.totalorder %s2688_s22, %s4671_s23  ;;  %p4677_p6 = scmp.lt.s32.totalorder %s4671_s23, %s4671_s23 }
 0x373   :  { %p4678_p7 = por %p4677_p6, %p4676_p5 }
 0x375   :  { %p4679_p8 = pnand %p4678_p7, %p4672_p4 }
 0x411   :  { %v2662_v51 = vpop.f32.mrb[2].mxu1 }
 0x412   :  { %v4528_v27 = vadd.f32 1e-05, %v2662_v51  ;;  %v3950_v28 = vpop.f32.mrb[3].mxu1 }
 0x414   :  { %4581 = vrsqrt.f32 %v4528_v27 }
 0x41e   :  { %v4582_v29 = vpop.eup %4581 }
 0x41f   :  { %v2667_v30 = vmul.f32 %v4582_v29, %v5308_v15 }
 0x421   :  { %v2668_v33 = vmul.f32 %v2701_v32, %v2667_v30 }
 0x423   :  { %v2669_v36 = vadd.f32 %v2702_v49, %v2668_v33 }
 0x425   :  { %2670 = vst [vmem:[#allocation9] sm:$0xf] %v2669_v36 }
 0x426   :  { %4682 = shalt.err (!%p4679_p8)
}
 0x427   :  { %s4683_s26 = scalar_lea.hbm %s5452_s6, 64 }
 0x428   :  { %p4684_p9 = scmp.ne.s32.totalorder %s5452_s6, %s4683_s26  ;;  %p4687_p10 = scmp.lt.u32.totalorder %s4683_s26, %s5452_s6 }
 0x42a   :  { %p4689_p11 = pnand %p4687_p10, %p4684_p9 }
 0x42c   :  { %4692 = shalt.err (!%p4689_p11)
}
 0x42d   :  { %2690 = dma.vmem_to_hbm [thread:$0]  %s2688_s22, 64, %s5452_s6, [#allocation10]  }
 0x42e   :  { %4697 = dma.done.wait [#allocation4], 64  }
 0x42f   :  { %4698 = vsyncadd [#allocation4], 4294967232 }
 0x430   :  { %4699 = dma.done.wait [#allocation10], 64  }
 0x431   :  { %4700 = vsyncadd [#allocation10], 4294967232 }
 0x432   :  { %2697 = vsyncpa [#allocation3], 1 }
 0x433   :  { %2698 = vsyncpa [#allocation6], 1 }
 0x434   :  { %2699 = vsyncpa [#allocation4], 1 }
 0x435   :  { %2700 = vsyncpa [#allocation10], 1 }

</bundles_post_ra>
